<compile_context>
chip_gen: v5e
topology: v5e:2x2
jax: 0.10.0
libtpu: 0.0.40
codegen_flags: <defaults>
</compile_context>

<pallas_src>
import functools
import math

import jax
import jax.numpy as jnp
from jax import lax
from jax.experimental import pallas as pl
from jax.experimental.pallas import tpu as pltpu

_INV_LN10 = 1.0 / math.log(10.0)
_PAD_LOGIT = 30000.0  # finite; exp(0 - 30000) == 0.0 exactly in f32


def _vmem_capacity_bytes() -> int:
    try:
        return int(pltpu.get_tpu_info().vmem_capacity_bytes)
    except Exception:
        return 64 * 1024 * 1024  # conservative fallback (v7x per-TC size)


def _num_tensorcores() -> int:
    """TensorCores per device: 2 on v7x, 1 on v5e/v6e (safe fallback: 1)."""
    try:
        info = pltpu.get_tpu_info()
        for name in ("num_cores", "core_count", "num_tensorcores"):
            v = getattr(info, name, None)
            if isinstance(v, int) and 1 <= v <= 8:
                return v
    except Exception:
        pass
    try:
        if "v7" in jax.devices()[0].device_kind.lower():
            return 2
    except Exception:
        pass
    return 1


def _entropy_kernel(x_ref, o_ref, *, use_mxu_rowsum: bool):
    """Accumulate sum_rows sum_j p*ln(p) for one (tile_n, C) row tile."""
    i = pl.program_id(1)

    @pl.when(i == 0)
    def _():
        o_ref[0, 0] = jnp.float32(0.0)

    x = x_ref[...].astype(jnp.float32)                    # (tile_n, C)
    m = jnp.max(x, axis=1, keepdims=True)                 # XLU row max
    xm = x - m
    e = jnp.exp(xm)                                       # single EUP op / elem

    if use_mxu_rowsum:
        # Row sums on the (otherwise idle) MXU; exact precision so the
        # self-test tolerances still hold.
        ones = jnp.ones((x.shape[1], 1), dtype=jnp.float32)
        s = jnp.dot(e, ones, precision=lax.Precision.HIGHEST,
                    preferred_element_type=jnp.float32)
        num = jnp.dot(e * xm, ones, precision=lax.Precision.HIGHEST,
                      preferred_element_type=jnp.float32)
    else:
        s = jnp.sum(e, axis=1, keepdims=True)             # (tile_n, 1)
        num = jnp.sum(e * xm, axis=1, keepdims=True)      # (tile_n, 1)

    # per-row sum_j p*ln(p) = num/s - ln(s); log/divide are per-row only.
    h = num * pl.reciprocal(s, approx=False) - jnp.log(s)

    # Scalar accumulation straight into the resident SMEM output block.
    o_ref[0, 0] += jnp.sum(h)


def entropy_regu(x: jax.Array, *, tile_n: int | None = None,
                 use_mxu_rowsum: bool = False) -> jax.Array:
    """Pallas implementation of EntropyRegu.forward (softmax over dim 1)."""
    batch = x.shape[0]
    C = x.shape[1]
    if x.ndim != 2:
        # softmax(dim=1) over extra spatial dims == independent rows of size C.
        x = jnp.moveaxis(x, 1, -1).reshape(-1, C)
    N = x.shape[0]
    itemsize = x.dtype.itemsize

    n_split = _num_tensorcores()
    vmem_cap = _vmem_capacity_bytes()
    big_vmem = vmem_cap >= 100 * 1024 * 1024            # v5e / v6e (128 MiB)
    vmem_limit = (64 if big_vmem else 48) * 1024 * 1024
    input_tile_budget = (12 if big_vmem else 6) * 1024 * 1024

    if tile_n is None:
        # Working set per tile row:
        #   2 x input buffer (Pallas double-buffering) : 2 * C * itemsize
        #   ~4 full-width f32 temporaries (x/xm/e/e*xm): 4 * C * 4
        #   ~4 lane-padded (tile_n, 1) f32 columns     : 4 * 512
        ws_per_row = C * (2 * itemsize + 16) + 2048
        ws_budget = int(vmem_limit * 0.75)
        cap = min(ws_budget // ws_per_row,
                  input_tile_budget // max(1, C * itemsize))
        per_core = max(8, ((-(-N // n_split) + 7) // 8) * 8)
        tile_n = min(max(8, (cap // 8) * 8), per_core)
    tile_n = max(8, (tile_n // 8) * 8)

    n_tiles_total = -(-N // tile_n)
    tiles_per_core = -(-n_tiles_total // n_split)
    n_pad = n_split * tiles_per_core * tile_n
    if n_pad != N:
        # Pad rows are [BIG, 0, ..., 0]: exp(0-BIG)==0, s==1, num==0, so each
        # padded row contributes exactly 0 -> no in-kernel masking needed.
        pad = jnp.zeros((n_pad - N, C), dtype=x.dtype)
        pad = pad.at[:, 0].set(jnp.asarray(_PAD_LOGIT, dtype=x.dtype))
        x = jnp.concatenate([x, pad], axis=0)

    kernel = functools.partial(_entropy_kernel, use_mxu_rowsum=use_mxu_rowsum)

    partials = pl.pallas_call(
        kernel,
        out_shape=jax.ShapeDtypeStruct((n_split, 1), jnp.float32),
        grid_spec=pltpu.PrefetchScalarGridSpec(
            num_scalar_prefetch=0,
            grid=(n_split, tiles_per_core),
            in_specs=[
                pl.BlockSpec((tile_n, C),
                             lambda c, i: (c * tiles_per_core + i, 0)),
            ],
            # Scalar partial per core lives in SMEM (standard scalar-reduction
            # pattern; avoids a (1,1) block of a VMEM array).
            out_specs=pl.BlockSpec((1, 1), lambda c, i: (c, 0),
                                   memory_space=pltpu.MemorySpace.SMEM),
        ),
        compiler_params=pltpu.CompilerParams(
            dimension_semantics=("parallel", "arbitrary"),
            vmem_limit_bytes=vmem_limit,
        ),
    )(x)

    # sum_rows sum_j p*ln(p)  ->  * 1/ln(10)  ->  / original batch size
    return jnp.sum(partials) * jnp.float32(_INV_LN10) / jnp.float32(batch)


def entropy_regu_ref(x: jax.Array) -> jax.Array:
    """Pure-JAX reference (mirrors the PyTorch module)."""
    p = jax.nn.softmax(x.astype(jnp.float32), axis=1)
    return jnp.sum(p * (jnp.log(p) / jnp.log(10.0))) / x.shape[0]


if __name__ == "__main__":
    key = jax.random.PRNGKey(0)
    k1, k2, k3, k4 = jax.random.split(key, 4)

    # (batch, classes) logits — the module's canonical use.
    cases = [
        (jax.random.normal(k1, (8, 32), dtype=jnp.float32), {}),
        # Non-divisible batch: exercises the zero-cost one-hot row padding.
        (jax.random.normal(k2, (13, 96), dtype=jnp.float32), {}),
        # Forced small tile: exercises multi-step SMEM accumulation and the
        # optional MXU row-sum path.
        (jax.random.normal(k3, (32, 256), dtype=jnp.float32) * 3.0,
         {"tile_n": 8, "use_mxu_rowsum": True}),
        # 4-D input (batch, channels, H, W): softmax over dim 1.
        (jax.random.normal(k4, (2, 4, 16, 16), dtype=jnp.float32), {}),
    ]
    for xin, kwargs in cases:
        got = jax.block_until_ready(entropy_regu(xin, **kwargs))
        ref = jax.block_until_ready(entropy_regu_ref(xin))
        assert jnp.allclose(got, ref, atol=1e-5, rtol=1e-5), (xin.shape, got, ref)

    print("KERNEL_OK")
</pallas_src>

<mosaic_0001>
module attributes {stable_mosaic.version = 11 : i64} {
  func.func @_entropy_kernel(%arg0: i32, %arg1: i32, %arg2: memref<8x32xf32, #tpu.memory_space<vmem>>, %arg3: memref<1x1xf32, #tpu.memory_space<smem>>) attributes {dimension_semantics = [#tpu.dimension_semantics<parallel>, #tpu.dimension_semantics<arbitrary>], iteration_bounds = array<i64: 1, 1>, scalar_prefetch = 0 : i64, scratch_operands = 0 : i64, tpu.core_type = #tpu.core_type<tc>, window_params = [{transform_indices = @transform_0, window_bounds = array<i64: 8, 32>}, {transform_indices = @transform_1, window_bounds = array<i64: 1, 1>}]} {
    %c0_i32 = arith.constant 0 : i32
    %0 = arith.cmpi eq, %arg1, %c0_i32 : i32
    %1 = arith.extui %0 : i1 to i32
    %c0_i32_0 = arith.constant 0 : i32
    %2 = arith.cmpi ne, %1, %c0_i32_0 : i32
    scf.if %2 {
      %cst_9 = arith.constant 0.000000e+00 : f32
      %c0_10 = arith.constant 0 : index
      %c0_11 = arith.constant 0 : index
      %25 = memref.load %arg3[%c0_10, %c0_11] : memref<1x1xf32, #tpu.memory_space<smem>>
      memref.store %cst_9, %arg3[%c0_10, %c0_11] : memref<1x1xf32, #tpu.memory_space<smem>>
    } else {
    }
    %c0 = arith.constant 0 : index
    %c0_1 = arith.constant 0 : index
    %3 = vector.load %arg2[%c0, %c0_1] : memref<8x32xf32, #tpu.memory_space<vmem>>, vector<8x32xf32>
    %cst = arith.constant dense<0xFF800000> : vector<8xf32>
    %4 = vector.multi_reduction <maximumf>, %3, %cst [1] : vector<8x32xf32> to vector<8xf32>
    %5 = vector.shape_cast %4 : vector<8xf32> to vector<8x1xf32>
    %6 = vector.broadcast %5 : vector<8x1xf32> to vector<8x32xf32>
    %7 = arith.subf %3, %6 : vector<8x32xf32>
    %8 = math.exp %7 : vector<8x32xf32>
    %cst_2 = arith.constant dense<0.000000e+00> : vector<8xf32>
    %9 = vector.multi_reduction <add>, %8, %cst_2 [1] : vector<8x32xf32> to vector<8xf32>
    %10 = vector.shape_cast %9 : vector<8xf32> to vector<8x1xf32>
    %11 = arith.mulf %8, %7 : vector<8x32xf32>
    %cst_3 = arith.constant dense<0.000000e+00> : vector<8xf32>
    %12 = vector.multi_reduction <add>, %11, %cst_3 [1] : vector<8x32xf32> to vector<8xf32>
    %13 = vector.shape_cast %12 : vector<8xf32> to vector<8x1xf32>
    %14 = tpu.reciprocal %10 : vector<8x1xf32> -> vector<8x1xf32>
    %15 = arith.mulf %13, %14 : vector<8x1xf32>
    %16 = math.log %10 : vector<8x1xf32>
    %17 = arith.subf %15, %16 : vector<8x1xf32>
    %c0_4 = arith.constant 0 : index
    %c0_5 = arith.constant 0 : index
    %18 = memref.load %arg3[%c0_4, %c0_5] : memref<1x1xf32, #tpu.memory_space<smem>>
    %19 = vector.shape_cast %17 : vector<8x1xf32> to vector<1x8x1xf32>
    %cst_6 = arith.constant dense<0.000000e+00> : vector<1xf32>
    %20 = vector.multi_reduction <add>, %19, %cst_6 [1, 2] : vector<1x8x1xf32> to vector<1xf32>
    %21 = vector.shape_cast %20 : vector<1xf32> to vector<1x1x1xf32>
    %22 = vector.extract %21[0, 0, 0] : f32 from vector<1x1x1xf32>
    %23 = arith.addf %18, %22 : f32
    %c0_7 = arith.constant 0 : index
    %c0_8 = arith.constant 0 : index
    %24 = memref.load %arg3[%c0_7, %c0_8] : memref<1x1xf32, #tpu.memory_space<smem>>
    memref.store %23, %arg3[%c0_7, %c0_8] : memref<1x1xf32, #tpu.memory_space<smem>>
    return
  }
  func.func @transform_0(%arg0: i32, %arg1: i32) -> (i32, i32) {
    %c1_i32 = arith.constant 1 : i32
    %0 = arith.muli %arg0, %c1_i32 : i32
    %1 = arith.addi %0, %arg1 : i32
    %c0_i32 = arith.constant 0 : i32
    %c0_i32_0 = arith.constant 0 : i32
    return %1, %c0_i32 : i32, i32
  }
  func.func @transform_1(%arg0: i32, %arg1: i32) -> (i32, i32) {
    %c0_i32 = arith.constant 0 : i32
    %c0_i32_0 = arith.constant 0 : i32
    return %arg0, %c0_i32 : i32, i32
  }
}

</mosaic_0001>

<bundles_post_ra>
// kernel: tpu_custom_call.1
= control target key start
LH: loop header
LB: loop body
LE: loop exit
PB: predicated region body
PF: predicated region fallthrough
CT: control target
= control target key end

     0   :  { %6 = vsyncpa [#allocation3], 0  ;;  %s166_s0 = inlined_call_operand.hbm [shape: f32[8,32], index: 0, kind: input, shape index: {}]   ;;  %s167_s1 = inlined_call_operand.hbm [shape: f32[1,1], index: 1, kind: output, shape index: {}]  }
   0x1   :  { %7 = vsyncpa [#allocation4], 0  ;;  %s16_s8 = sshll.u32 %s166_s0, 4  ;;  %s148_s9 = smov [#allocation2]   ;;  %s17_s8 = int_to_ptr.hbm [resolvable:$true] %s16_s8 }
   0x2   :  { %s18_s10 = sshll.u32 %s148_s9, 4  ;;  %s19_s10 = int_to_ptr.vmem [resolvable:$true] %s18_s10 }
   0x3   :  { %21 = dma.hbm_to_vmem [thread:$0]  %s17_s8, 128, %s19_s10, [#allocation3]  }
   0x4   :  { %144 = dma.done.wait [#allocation3], 128  }
   0x5   :  { %145 = vsyncadd [#allocation3], 4294967168  ;;  %vm34_vm0 = vcmask 261120   ;;  %v33_v0 = vld [vmem:[#allocation2] sm:$0xff]  ;;  %vm67_vm5 = vcmask 7168   ;;  %s86_s12 = sshll.u32 %s167_s1, 4  ;;  %s87_s12 = int_to_ptr.hbm [resolvable:$true] %s86_s12 }
   0x6   :  { %v35_v1 = vsel %vm34_vm0, %v33_v0, -inf  ;;  %s149_s14 = smov [#allocation5]  }
   0x7   :  { %36 = vmax.xlane.f32.xlu0 %v35_v1 }
  0x7a   :  { %v37_v2 = vpop.xlane.xlu0 %36 }
  0x7b   :  { %v38_v3 = vsub.f32 %v33_v0, %v37_v2 }
  0x7d   :  { %v39_v4 = vmul.f32 1.442695, %v38_v3 }
  0x7f   :  { %102 = vpow2.f32 %v39_v4 }
  0x85   :  { %v103_v5 = vpop.eup %102 }
  0x86   :  { %v41_v6 = vsel %vm34_vm0, %v103_v5, 0.0  ;;  %v44_v7 = vmul.f32 %v103_v5, %v38_v3 }
  0x87   :  { %42 = vadd.xlane.f32.xlu0 %v41_v6 }
  0x88   :  { %v45_v8 = vsel %vm34_vm0, %v44_v7, 0.0 }
  0x89   :  { %46 = vadd.xlane.f32.xlu1 %v45_v8 }
  0xfa   :  { %v43_v9 = vpop.xlane.xlu0 %42 }
  0xfb   :  { %104 = vrcp.f32 %v43_v9  ;;  %v59_v13 = vand.u32 2147483648, %v43_v9  ;;  %v57_v15 = vand.u32 2147483647, %v43_v9  ;;  %vm53_vm2 = vweird.f32 %v43_v9 }
  0xfc   :  { %106 = vlog2.f32 %v43_v9  ;;  %v47_v20 = vpop.xlane.xlu1 %46 }
  0xfd   :  { %v60_v18 = vor.u32 1.1754944e-38, %v59_v13  ;;  %vm58_vm4 = vcmp.eq.f32.partialorder %v57_v15, 8.507059e+37 }
 0x101   :  { %v105_v10 = vpop.eup %104 }
 0x102   :  { %v49_v11 = vmul.f32 %v105_v10, %v43_v9  ;;  %vm54_vm1 = vweird.f32 %v105_v10  ;;  %v107_v17 = vpop.eup %106 }
 0x103   :  { %vm55_vm3 = vmor %vm53_vm2, %vm54_vm1  ;;  %v64_v23 = vmul.f32 0.6931472, %v107_v17 }
 0x104   :  { %v50_v12 = vsub.f32 1.0, %v49_v11 }
 0x106   :  { %v51_v14 = vmul.f32 %v105_v10, %v50_v12 }
 0x108   :  { %v52_v16 = vadd.f32 %v105_v10, %v51_v14 }
 0x10a   :  { %v56_v19 = vsel %vm55_vm3, %v105_v10, %v52_v16 }
 0x10b   :  { %v61_v21 = vsel %vm58_vm4, %v60_v18, %v56_v19 }
 0x10c   :  { %v62_v22 = vmul.f32 %v61_v21, %v47_v20 }
 0x10e   :  { %v65_v24 = vsub.f32 %v62_v22, %v64_v23 }
 0x110   :  { %v68_v25 = vsel %vm67_vm5, %v65_v24, 0.0 }
 0x111   :  { %69 = vadd.xlane.f32.xlu1 %v68_v25 }
 0x184   :  { %v70_v26 = vpop.xlane.xlu1 %69 }
 0x185   :  { %v71_v27 = vrot.slane %v70_v26, 4 }
 0x187   :  { %v72_v28 = vadd.f32 %v71_v27, %v70_v26 }
 0x189   :  { %v73_v29 = vrot.slane %v72_v28, 2 }
 0x18b   :  { %v74_v30 = vadd.f32 %v73_v29, %v72_v28 }
 0x18d   :  { %v75_v31 = vrot.slane %v74_v30, 1 }
 0x18f   :  { %v76_v32 = vadd.f32 %v75_v31, %v74_v30 }
 0x191   :  { %97 = vpush %v76_v32 }
 0x1c2   :  { %s98_s13 = spop %97 }
 0x1c3   :  { %80 = sst [smem:[#allocation5]] %s98_s13 }
 0x1c4   :  { %89 = dma.smem_to_hbm %s149_s14, 16, %s87_s12, [#allocation4]  }
 0x1c5   :  { %146 = dma.done.wait [#allocation4], 16  }
 0x1c6   :  { %147 = vsyncadd [#allocation4], 4294967280 }
 0x1c7   :  { %94 = sfence }
 0x1c8   :  { %95 = vsyncpa [#allocation3], 1 }
 0x1c9   :  { %96 = vsyncpa [#allocation4], 1 }

</bundles_post_ra>
